<compile_context>
chip_gen: v7x
topology: tpu7x:2x2x1
jax: 0.10.0
libtpu: 0.0.40
codegen_flags: <defaults>
</compile_context>

<pallas_src>
import functools

import jax
import jax.numpy as jnp
from jax.experimental import pallas as pl
from jax.experimental.pallas import tpu as pltpu


# -----------------------------------------------------------------------------
# Parameter setup (plain JAX glue; mirrors the torch __init__ exactly)
# -----------------------------------------------------------------------------
def make_positional_table(num_hiddens: int, nrow: int, ncol: int):
    assert num_hiddens % 2 == 0, "num_hiddens must be even (as in the torch code)"
    denom = jnp.power(
        10000.0,
        jnp.arange(0, num_hiddens, 2, dtype=jnp.float32) / num_hiddens,
    )  # (num_hiddens // 2,)

    xr = jnp.arange(nrow, dtype=jnp.float32)[:, None] / denom[None, :]  # (H, C/2)
    p_row = jnp.zeros((nrow, num_hiddens), jnp.float32)
    p_row = p_row.at[:, 0::2].set(jnp.sin(xr))
    p_row = p_row.at[:, 1::2].set(jnp.cos(xr))

    xc = jnp.arange(ncol, dtype=jnp.float32)[:, None] / denom[None, :]  # (W, C/2)
    p_col = jnp.zeros((ncol, num_hiddens), jnp.float32)
    p_col = p_col.at[:, 0::2].set(jnp.sin(xc))
    p_col = p_col.at[:, 1::2].set(jnp.cos(xc))

    # torch: P = einsum('b h c n, b c w n -> b n h w', P_row, P_col)
    #          == P_row[h, n] * P_col[w, n]   (the 'c' axis has size 1)
    return jnp.einsum("hn,wn->nhw", p_row, p_col)  # (num_hiddens, nrow, ncol)


# -----------------------------------------------------------------------------
# Kernels (pure elementwise; memory-bound -> all math hides under the stream)
# -----------------------------------------------------------------------------
def _pe_eval_kernel(x_ref, p_ref, o_ref):
    # x_ref: (bt, N) or (bt, C, HW); p_ref has a leading 1 on the batch axis.
    o_ref[...] = (x_ref[...].astype(jnp.float32) + p_ref[...]).astype(o_ref.dtype)


def _pe_dropout_kernel(x_ref, p_ref, bits_ref, o_ref, *, thresh: int, inv_keep: float):
    # TODO(synk): RNG stream differs from torch.nn.Dropout; inverted-dropout
    # semantics (keep-prob scaling) are reproduced exactly.
    y = x_ref[...].astype(jnp.float32) + p_ref[...]
    keep = bits_ref[...] >= jnp.int32(thresh)  # integer threshold: 1 cmp, no u32->f32
    o_ref[...] = jnp.where(keep, y * jnp.float32(inv_keep),
                           jnp.zeros_like(y)).astype(o_ref.dtype)


# -----------------------------------------------------------------------------
# Generation-aware sizing helpers
# -----------------------------------------------------------------------------
def _vmem_limit_bytes() -> int:
    # v5e/v6e: 128 MiB physical -> 96 MiB scoped; v7x: 64 MiB per TC -> 48 MiB.
    try:
        cap = int(getattr(pltpu.get_tpu_info(), "vmem_capacity_bytes", 64 << 20))
    except Exception:  # no TPU visible (e.g. interpret mode on CPU)
        cap = 64 << 20
    return int(min(cap * 3 // 4, 96 << 20))


def _choose_tiling(B, C, HW, itemsize, training, vmem_limit, p_bytes):
    """Returns (layout, batch_tile). layout is '2d' (B, C*HW) or '3d' (B, C, HW)."""
    # Live VMEM per batch row: double-buffered x-in + out (+ int32 bits when
    # training); the P block is resident once (p_bytes).
    row_bytes = C * HW * (2 * itemsize + (4 if training else 0)) * 2
    budget = max(1 << 20, int(vmem_limit * 0.7) - p_bytes)
    bt_cap = max(1, budget // max(row_bytes, 1))

    if bt_cap >= B:
        return "2d", B  # whole batch in one (or few) big lane-dense blocks

    # Lane-dense flat layout needs the batch tile (second-to-last block dim)
    # to be a multiple of 8 (or the full B).
    bt = (min(bt_cap, B) // 8) * 8
    while bt >= 8:
        if B % bt == 0:
            return "2d", bt
        bt -= 8

    # Fallback: (bt, C, HW) blocks — last two dims equal the full array dims,
    # so any bt dividing B is layout-legal (lane width is only HW though).
    bt = min(bt_cap, B)
    while B % bt:
        bt -= 1
    return "3d", max(int(bt), 1)


# -----------------------------------------------------------------------------
# Wrapper
# -----------------------------------------------------------------------------
def positional_encoding(x, pos_table, *, dropout_p: float = 0.0, rng_key=None,
                        prefer_xla_fusion: bool = False, donate_x: bool = False):
    """x: (B, C=num_hiddens, H=nrow, W=ncol); pos_table: (C, H, W) float32."""
    B, C, H, W = x.shape
    assert pos_table.shape == (C, H, W)
    HW = H * W
    p32 = pos_table.astype(jnp.float32)
    # torch adds an fp32 buffer to X (type-promotes), so the output is fp32
    # even for half-precision X.
    out_dtype = jnp.promote_types(x.dtype, jnp.float32)

    if dropout_p >= 1.0:  # degenerate: everything dropped
        return jnp.zeros(x.shape, out_dtype)

    training = dropout_p > 0.0

    if not training and prefer_xla_fusion:
        # Perf review: a standalone elementwise pallas_call forces a full HBM
        # round trip; in a real model let XLA fuse the eval-mode add instead.
        return (x.astype(jnp.float32) + p32[None]).astype(out_dtype)

    vmem_limit = _vmem_limit_bytes()
    p_bytes = C * HW * 4
    layout, bt = _choose_tiling(B, C, HW, x.dtype.itemsize, training,
                                vmem_limit, p_bytes)

    if layout == "2d":
        n = C * HW
        x_v = x.reshape(B, n)
        p_v = p32.reshape(1, n)
        blk_x, blk_p = (bt, n), (1, n)
        x_map = lambda b: (b, 0)
        p_map = lambda b: (0, 0)
    else:
        x_v = x.reshape(B, C, HW)
        p_v = p32.reshape(1, C, HW)
        blk_x, blk_p = (bt, C, HW), (1, C, HW)
        x_map = lambda b: (b, 0, 0)
        p_map = lambda b: (0, 0, 0)

    grid = (B // bt,)
    x_spec = pl.BlockSpec(blk_x, x_map)
    p_spec = pl.BlockSpec(blk_p, p_map)  # constant block index -> stays resident in VMEM
    o_spec = pl.BlockSpec(blk_x, x_map)
    out_shape = jax.ShapeDtypeStruct(x_v.shape, out_dtype)

    # TODO(synk): on v7x, pltpu.CORE_PARALLEL on the batch grid axis (with an
    # even number of grid steps) would shard this HBM-bound stream across both
    # TensorCores; kept as PARALLEL here for portability across generations.
    compiler_params = pltpu.CompilerParams(
        dimension_semantics=(pltpu.PARALLEL,),
        vmem_limit_bytes=vmem_limit,
    )
    io_aliases = {0: 0} if (donate_x and out_dtype == x.dtype) else {}

    if training:
        if rng_key is None:
            rng_key = jax.random.PRNGKey(0)
        # Randomness drawn in plain JAX (the Mosaic-only stateful PRNG does not
        # lower outside real TPU codegen); bitcast to int32 for a cheap signed
        # threshold compare in-kernel.
        bits = jax.lax.bitcast_convert_type(
            jax.random.bits(rng_key, x_v.shape, jnp.uint32), jnp.int32)
        thresh = int(round(float(dropout_p) * 4294967296.0)) - 2147483648
        thresh = max(-2147483648, min(2147483647, thresh))
        kernel = functools.partial(_pe_dropout_kernel, thresh=thresh,
                                   inv_keep=1.0 / (1.0 - float(dropout_p)))
        out_v = pl.pallas_call(
            kernel,
            out_shape=out_shape,
            grid=grid,
            in_specs=[x_spec, p_spec, pl.BlockSpec(blk_x, x_map)],
            out_specs=o_spec,
            compiler_params=compiler_params,
            input_output_aliases=io_aliases,
        )(x_v, p_v, bits)
    else:
        out_v = pl.pallas_call(
            _pe_eval_kernel,
            out_shape=out_shape,
            grid=grid,
            in_specs=[x_spec, p_spec],
            out_specs=o_spec,
            compiler_params=compiler_params,
            input_output_aliases=io_aliases,
        )(x_v, p_v)

    return out_v.reshape(B, C, H, W)


# -----------------------------------------------------------------------------
# Test
# -----------------------------------------------------------------------------
if __name__ == "__main__":
    num_hiddens, nrow, ncol, batch = 32, 16, 16, 2

    key = jax.random.PRNGKey(0)
    x = jax.random.normal(key, (batch, num_hiddens, nrow, ncol), jnp.float32)

    P = make_positional_table(num_hiddens, nrow, ncol)  # (C, H, W)
    ref = x + P[None]  # pure-JAX reference of the torch forward (eval mode)

    # --- eval mode (dropout is identity): exact check against reference -----
    out = positional_encoding(x, P, dropout_p=0.0)
    out = jax.block_until_ready(out)
    assert out.shape == x.shape and out.dtype == x.dtype
    assert jnp.allclose(out, ref, atol=1e-5, rtol=1e-5), "eval-mode mismatch"

    # --- train mode (dropout_p=0.5): every element is 0 or (x+P)/keep_prob --
    drop_p = 0.5
    out_d = jax.block_until_ready(
        positional_encoding(x, P, dropout_p=drop_p, rng_key=jax.random.PRNGKey(123))
    )
    scaled = ref / (1.0 - drop_p)
    is_zero = jnp.abs(out_d) <= 1e-6
    is_kept = jnp.abs(out_d - scaled) <= 1e-4 * (1.0 + jnp.abs(scaled))
    assert bool(jnp.all(is_zero | is_kept)), "dropout output not in {0, scaled}"
    keep_frac = float(1.0 - jnp.mean(is_zero.astype(jnp.float32)))
    assert 0.3 < keep_frac < 0.7, f"unexpected keep fraction {keep_frac}"

    print("KERNEL_OK")
</pallas_src>

<mosaic_0001>
module attributes {stable_mosaic.version = 11 : i64} {
  func.func @_pe_eval_kernel(%arg0: i32, %arg1: memref<2x8192xf32, #tpu.memory_space<vmem>>, %arg2: memref<1x8192xf32, #tpu.memory_space<vmem>>, %arg3: memref<2x8192xf32, #tpu.memory_space<vmem>>) attributes {dimension_semantics = [#tpu.dimension_semantics<parallel>], iteration_bounds = array<i64: 1>, scalar_prefetch = 0 : i64, scratch_operands = 0 : i64, tpu.core_type = #tpu.core_type<tc>, window_params = [{transform_indices = @transform_0, window_bounds = array<i64: 2, 8192>}, {pipeline_mode = #tpu.pipeline_mode<synchronous>, transform_indices = @transform_1, window_bounds = array<i64: 1, 8192>}, {transform_indices = @transform_2, window_bounds = array<i64: 2, 8192>}]} {
    %c0 = arith.constant 0 : index
    %c0_0 = arith.constant 0 : index
    %0 = vector.load %arg1[%c0, %c0_0] : memref<2x8192xf32, #tpu.memory_space<vmem>>, vector<2x8192xf32>
    %c0_1 = arith.constant 0 : index
    %c0_2 = arith.constant 0 : index
    %1 = vector.load %arg2[%c0_1, %c0_2] : memref<1x8192xf32, #tpu.memory_space<vmem>>, vector<1x8192xf32>
    %2 = vector.broadcast %1 : vector<1x8192xf32> to vector<2x8192xf32>
    %3 = arith.addf %0, %2 : vector<2x8192xf32>
    %c0_3 = arith.constant 0 : index
    %c0_4 = arith.constant 0 : index
    %4 = vector.load %arg3[%c0_3, %c0_4] : memref<2x8192xf32, #tpu.memory_space<vmem>>, vector<2x8192xf32>
    tpu.vector_store %arg3[%c0_3, %c0_4], %3 {strides = array<i32>} : memref<2x8192xf32, #tpu.memory_space<vmem>>, vector<2x8192xf32>,
    return
  }
  func.func @transform_0(%arg0: i32) -> (i32, i32) {
    %c0_i32 = arith.constant 0 : i32
    %c0_i32_0 = arith.constant 0 : i32
    return %arg0, %c0_i32 : i32, i32
  }
  func.func @transform_1(%arg0: i32) -> (i32, i32) {
    %c0_i32 = arith.constant 0 : i32
    %c0_i32_0 = arith.constant 0 : i32
    %c0_i32_1 = arith.constant 0 : i32
    return %c0_i32, %c0_i32_0 : i32, i32
  }
  func.func @transform_2(%arg0: i32) -> (i32, i32) {
    %c0_i32 = arith.constant 0 : i32
    %c0_i32_0 = arith.constant 0 : i32
    return %arg0, %c0_i32 : i32, i32
  }
}

</mosaic_0001>

<bundles_post_ra>
// kernel: tpu_custom_call.1
= control target key start
LH: loop header
LB: loop body
LE: loop exit
PB: predicated region body
PF: predicated region fallthrough
CT: control target
= control target key end

     0   :  { %7 = vsyncpa [#allocation3], 0  ;;  %s905_s0 = inlined_call_operand.hbm [shape: f32[2,8192], index: 0, kind: input, shape index: {}]   ;;  %s906_s1 = inlined_call_operand.hbm [shape: f32[1,8192], index: 1, kind: input, shape index: {}]   ;;  %s907_s2 = inlined_call_operand.hbm [shape: f32[2,8192], index: 2, kind: output, shape index: {}]  }
   0x1   :  { %8 = vsyncpa [#allocation6], 0 }
   0x2   :  { %9 = vsyncpa [#allocation4], 0  ;;  %s736_s9 = smov [#allocation2]   ;;  %s737_s11 = smov [#allocation5]  }
   0x3   :  { %s16_s10 = sshll.u32 %s736_s9, 4  ;;  %s26_s12 = sshll.u32 %s737_s11, 4  ;;  %s17_s10 = int_to_ptr.vmem [resolvable:$true] %s16_s10  ;;  %s27_s12 = int_to_ptr.vmem [resolvable:$true] %s26_s12 }
   0x4   :  { %s664_s15 = scalar_lea.hbm %s905_s0, 2048 }
   0x5   :  { %p665_p0 = scmp.ne.s32.totalorder %s905_s0, %s664_s15  ;;  %p668_p1 = scmp.lt.u32.totalorder %s664_s15, %s905_s0 }
   0x7   :  { %p670_p2 = pnand %p668_p1, %p665_p0 }
   0x9   :  { %673 = shalt.err (!%p670_p2)
}
   0xa   :  { %s674_s20 = scalar_lea.vmem %s17_s10, 2048  ;;  %p679_p4 = scmp.lt.s32.totalorder %s17_s10, %s17_s10 }
   0xb   :  { %p675_p3 = scmp.ne.s32.totalorder %s17_s10, %s674_s20  ;;  %p680_p5 = scmp.lt.s32.totalorder %s674_s20, %s674_s20 }
   0xd   :  { %p681_p6 = por %p680_p5, %p679_p4 }
   0xf   :  { %p682_p7 = pnand %p681_p6, %p675_p3 }
  0x11   :  { %685 = shalt.err (!%p682_p7)
}
  0x12   :  { %19 = dma.hbm_to_vmem [thread:$0]  %s905_s0, 2048, %s17_s10, [#allocation3]  }
  0x13   :  { %s686_s25 = scalar_lea.hbm %s906_s1, 1024 }
  0x14   :  { %p687_p8 = scmp.ne.s32.totalorder %s906_s1, %s686_s25  ;;  %p690_p9 = scmp.lt.u32.totalorder %s686_s25, %s906_s1 }
  0x16   :  { %p692_p10 = pnand %p690_p9, %p687_p8 }
  0x18   :  { %695 = shalt.err (!%p692_p10)
}
  0x19   :  { %s696_s30 = scalar_lea.vmem %s27_s12, 1024  ;;  %p701_p12 = scmp.lt.s32.totalorder %s27_s12, %s27_s12 }
  0x1a   :  { %p697_p11 = scmp.ne.s32.totalorder %s27_s12, %s696_s30  ;;  %p702_p13 = scmp.lt.s32.totalorder %s696_s30, %s696_s30 }
  0x1c   :  { %p703_p0 = por %p702_p13, %p701_p12 }
  0x1e   :  { %p704_p1 = pnand %p703_p0, %p697_p11 }
  0x20   :  { %707 = shalt.err (!%p704_p1)
}
  0x21   :  { %29 = dma.hbm_to_vmem [thread:$0]  %s906_s1, 1024, %s27_s12, [#allocation6]  }
  0x22   :  { %730 = dma.done.wait [#allocation3], 2048  }
  0x23   :  { %731 = vsyncadd [#allocation3], 4294965248 }
  0x24   :  { %732 = dma.done.wait [#allocation6], 1024  }
  0x25   :  { %733 = vsyncadd [#allocation6], 4294966272  ;;  %v68_v0 = vlaneseq  ;;  %v738_v1 = vmov 1983009808   ;;  %v52_v13 = vld [vmem:[#allocation5] sm:$0xff]  ;;  %v53_v19 = vld [vmem:[#allocation5 + $0x8] sm:$0xff] }
  0x26   :  { %v327_v2 = vunpack.c.l.s4 %v738_v1  ;;  %v54_v36 = vld [vmem:[#allocation5 + $0x10] sm:$0xff]  ;;  %v36_v37 = vld [vmem:[#allocation2] sm:$0xff]  ;;  %v37_v43 = vld [vmem:[#allocation2 + $0x8] sm:$0xff]  ;;  %s739_s1 = smov [#allocation7]  }
  0x27   :  { %v69_v3 = vshrl.u32 %v68_v0, 7  ;;  %v38_v52 = vld [vmem:[#allocation2 + $0x10] sm:$0xff]  ;;  %v55_v60 = vld [vmem:[#allocation5 + $0x18] sm:$0xff]  ;;  %s650_s4 = sshll.u32 %s739_s1, 4  ;;  %s651_s4 = int_to_ptr.vmem [resolvable:$true] %s650_s4 }
  0x28   :  { %v328_v4 = vunpack.c.0.s8 %v327_v2  ;;  %v39_v2 = vld [vmem:[#allocation2 + $0x18] sm:$0xff]  ;;  %s708_s5 = scalar_lea.vmem %s651_s4, 2048  ;;  %p713_p3 = scmp.lt.s32.totalorder %s651_s4, %s651_s4 }
  0x29   :  { %v779_v5 = vsub.s32 0, %v69_v3  ;;  %v781_v6 = vsub.s32 1, %v69_v3  ;;  %v783_v7 = vsub.s32 2, %v69_v3  ;;  %v785_v8 = vsub.s32 3, %v69_v3  ;;  %p709_p2 = scmp.ne.s32.totalorder %s651_s4, %s708_s5  ;;  %p714_p4 = scmp.lt.s32.totalorder %s708_s5, %s708_s5 }
  0x2a   :  { %v787_v9 = vsub.s32 4, %v69_v3  ;;  %v789_v10 = vsub.s32 5, %v69_v3  ;;  %v791_v11 = vsub.s32 6, %v69_v3  ;;  %v793_v12 = vsub.s32 7, %v69_v3 }
  0x2b   :  { %v795_v14 = vsub.s32 %v328_v4, %v69_v3  ;;  %v71_v15 = vrot.slane %v52_v13, %v779_v5  ;;  %v75_v16 = vrot.slane %v52_v13, %v781_v6  ;;  %v79_v17 = vrot.slane %v52_v13, %v783_v7  ;;  %p715_p5 = por %p714_p4, %p713_p3 }
  0x2c   :  { %v83_v18 = vrot.slane %v52_v13, %v785_v8  ;;  %v87_v20 = vrot.slane %v52_v13, %v787_v9  ;;  %v91_v21 = vrot.slane %v52_v13, %v789_v10  ;;  %v95_v22 = vrot.slane %v52_v13, %v791_v11 }
  0x2d   :  { %v99_v23 = vrot.slane %v52_v13, %v793_v12  ;;  %v324_v24 = vcombine.low %v71_v15, %v75_v16  ;;  %v103_v26 = vrot.slane %v53_v19, %v779_v5  ;;  %v107_v27 = vrot.slane %v53_v19, %v781_v6  ;;  %p716_p6 = pnand %p715_p5, %p709_p2 }
  0x2e   :  { %v325_v25 = vcombine.low %v79_v17, %v83_v18  ;;  %v341_v28 = vcombine.low %v87_v20, %v91_v21  ;;  %v111_v30 = vrot.slane %v53_v19, %v783_v7  ;;  %v115_v31 = vrot.slane %v53_v19, %v785_v8 }
  0x2f   :  { %v342_v29 = vcombine.low %v95_v22, %v99_v23  ;;  %v332_v32 = vrot.slane %v324_v24, %v795_v14  ;;  %v358_v34 = vcombine.low %v103_v26, %v107_v27  ;;  %v119_v35 = vrot.slane %v53_v19, %v787_v9  ;;  %v56_v23 = vld [vmem:[#allocation5 + $0x20] sm:$0xff] }
  0x30   :  { %v339_v33 = vrot.slane %v325_v25, %v795_v14  ;;  %v349_v38 = vrot.slane %v341_v28, %v795_v14  ;;  %v359_v40 = vcombine.low %v111_v30, %v115_v31  ;;  %v123_v41 = vrot.slane %v53_v19, %v789_v10  ;;  %v40_v25 = vld [vmem:[#allocation2 + $0x20] sm:$0xff] }
  0x31   :  { %v356_v39 = vrot.slane %v342_v29, %v795_v14  ;;  %v366_v44 = vrot.slane %v358_v34, %v795_v14  ;;  %v127_v45 = vrot.slane %v53_v19, %v791_v11  ;;  %v131_v46 = vrot.slane %v53_v19, %v793_v12 }
  0x32   :  { %v340_v42 = vcombine.low %v332_v32, %v339_v33  ;;  %v373_v48 = vrot.slane %v359_v40, %v795_v14  ;;  %v375_v49 = vcombine.low %v119_v35, %v123_v41  ;;  %v135_v50 = vrot.slane %v54_v36, %v779_v5  ;;  %v41_v33 = vld [vmem:[#allocation2 + $0x28] sm:$0xff] }
  0x33   :  { %v357_v47 = vcombine.low %v349_v38, %v356_v39  ;;  %v376_v53 = vcombine.low %v127_v45, %v131_v46  ;;  %v139_v54 = vrot.slane %v54_v36, %v781_v6  ;;  %v143_v55 = vrot.slane %v54_v36, %v783_v7  ;;  %v57_v46 = vld [vmem:[#allocation5 + $0x28] sm:$0xff] }
  0x34   :  { %v612_v51 = vadd.f32 %v340_v42, %v36_v37  ;;  %v374_v57 = vcombine.low %v366_v44, %v373_v48  ;;  %v383_v58 = vrot.slane %v375_v49, %v795_v14  ;;  %v147_v59 = vrot.slane %v54_v36, %v785_v8  ;;  %v42_v48 = vld [vmem:[#allocation2 + $0x30] sm:$0xff] }
  0x35   :  { %v613_v56 = vadd.f32 %v357_v47, %v37_v43  ;;  %v390_v61 = vrot.slane %v376_v53, %v795_v14  ;;  %v392_v62 = vcombine.low %v135_v50, %v139_v54  ;;  %v151_v63 = vrot.slane %v54_v36, %v787_v9 }
  0x36   :  { %628 = vst [vmem:[#allocation7] sm:$0xff] %v612_v51  ;;  %v155_v0 = vrot.slane %v54_v36, %v789_v10  ;;  %v614_v1 = vadd.f32 %v374_v57, %v38_v52  ;;  %v393_v3 = vcombine.low %v143_v55, %v147_v59  ;;  %v159_v4 = vrot.slane %v54_v36, %v791_v11 }
  0x37   :  { %629 = vst [vmem:[#allocation7 + $0x8] sm:$0xff] %v613_v56  ;;  %v163_v13 = vrot.slane %v54_v36, %v793_v12  ;;  %v391_v15 = vcombine.low %v383_v58, %v390_v61  ;;  %v400_v16 = vrot.slane %v392_v62, %v795_v14  ;;  %v167_v18 = vrot.slane %v55_v60, %v779_v5  ;;  %v43_v56 = vld [vmem:[#allocation2 + $0x38] sm:$0xff] }
  0x38   :  { %v409_v17 = vcombine.low %v151_v63, %v155_v0  ;;  %630 = vst [vmem:[#allocation7 + $0x10] sm:$0xff] %v614_v1  ;;  %v407_v19 = vrot.slane %v393_v3, %v795_v14  ;;  %v171_v21 = vrot.slane %v55_v60, %v781_v6  ;;  %v175_v22 = vrot.slane %v55_v60, %v783_v7 }
  0x39   :  { %v410_v20 = vcombine.low %v159_v4, %v163_v13  ;;  %v615_v24 = vadd.f32 %v391_v15, %v39_v2  ;;  %v179_v27 = vrot.slane %v55_v60, %v785_v8  ;;  %v183_v28 = vrot.slane %v55_v60, %v787_v9  ;;  %v58_v13 = vld [vmem:[#allocation5 + $0x30] sm:$0xff] }
  0x3a   :  { %v417_v26 = vrot.slane %v409_v17, %v795_v14  ;;  %v408_v29 = vcombine.low %v400_v16, %v407_v19  ;;  %v426_v31 = vcombine.low %v167_v18, %v171_v21  ;;  %v187_v32 = vrot.slane %v55_v60, %v789_v10  ;;  %v44_v16 = vld [vmem:[#allocation2 + $0x40] sm:$0xff] }
  0x3b   :  { %v424_v30 = vrot.slane %v410_v20, %v795_v14  ;;  %631 = vst [vmem:[#allocation7 + $0x18] sm:$0xff] %v615_v24  ;;  %v427_v34 = vcombine.low %v175_v22, %v179_v27  ;;  %v191_v35 = vrot.slane %v55_v60, %v791_v11  ;;  %v195_v36 = vrot.slane %v55_v60, %v793_v12  ;;  %v45_v24 = vld [vmem:[#allocation2 + $0x48] sm:$0xff] }
  0x3c   :  { %v199_v37 = vrot.slane %v56_v23, %v779_v5  ;;  %v616_v38 = vadd.f32 %v408_v29, %v40_v25  ;;  %v434_v40 = vrot.slane %v426_v31, %v795_v14  ;;  %v443_v41 = vcombine.low %v183_v28, %v187_v32 }
  0x3d   :  { %v425_v39 = vcombine.low %v417_v26, %v424_v30  ;;  %v441_v42 = vrot.slane %v427_v34, %v795_v14  ;;  %v444_v43 = vcombine.low %v191_v35, %v195_v36  ;;  %v203_v44 = vrot.slane %v56_v23, %v781_v6 }
  0x3e   :  { %v207_v45 = vrot.slane %v56_v23, %v783_v7  ;;  %632 = vst [vmem:[#allocation7 + $0x20] sm:$0xff] %v616_v38  ;;  %v451_v49 = vrot.slane %v443_v41, %v795_v14  ;;  %v211_v50 = vrot.slane %v56_v23, %v785_v8  ;;  %v215_v51 = vrot.slane %v56_v23, %v787_v9 }
  0x3f   :  { %v617_v47 = vadd.f32 %v425_v39, %v41_v33  ;;  %v442_v52 = vcombine.low %v434_v40, %v441_v42  ;;  %v458_v53 = vrot.slane %v444_v43, %v795_v14  ;;  %v460_v54 = vcombine.low %v199_v37, %v203_v44  ;;  %v59_v37 = vld [vmem:[#allocation5 + $0x38] sm:$0xff]  ;;  %v46_v39 = vld [vmem:[#allocation2 + $0x50] sm:$0xff] }
  0x40   :  { %v219_v55 = vrot.slane %v56_v23, %v789_v10  ;;  %v461_v57 = vcombine.low %v207_v45, %v211_v50  ;;  %v223_v58 = vrot.slane %v56_v23, %v791_v11  ;;  %v227_v59 = vrot.slane %v56_v23, %v793_v12 }
  0x41   :  { %633 = vst [vmem:[#allocation7 + $0x28] sm:$0xff] %v617_v47  ;;  %v231_v60 = vrot.slane %v57_v46, %v779_v5  ;;  %v618_v61 = vadd.f32 %v442_v52, %v42_v48  ;;  %v459_v62 = vcombine.low %v451_v49, %v458_v53  ;;  %v468_v63 = vrot.slane %v460_v54, %v795_v14  ;;  %v47_v47 = vld [vmem:[#allocation2 + $0x58] sm:$0xff] }
  0x42   :  { %v477_v0 = vcombine.low %v215_v51, %v219_v55  ;;  %v475_v1 = vrot.slane %v461_v57, %v795_v14  ;;  %v478_v2 = vcombine.low %v223_v58, %v227_v59  ;;  %v235_v3 = vrot.slane %v57_v46, %v781_v6 }
  0x43   :  { %v239_v4 = vrot.slane %v57_v46, %v783_v7  ;;  %634 = vst [vmem:[#allocation7 + $0x30] sm:$0xff] %v618_v61  ;;  %v619_v15 = vadd.f32 %v459_v62, %v43_v56  ;;  %v243_v18 = vrot.slane %v57_v46, %v785_v8  ;;  %v247_v19 = vrot.slane %v57_v46, %v787_v9  ;;  %v48_v61 = vld [vmem:[#allocation2 + $0x60] sm:$0xff] }
  0x44   :  { %v485_v17 = vrot.slane %v477_v0, %v795_v14  ;;  %v476_v20 = vcombine.low %v468_v63, %v475_v1  ;;  %v492_v21 = vrot.slane %v478_v2, %v795_v14  ;;  %v494_v22 = vcombine.low %v231_v60, %v235_v3 }
  0x45   :  { %v251_v23 = vrot.slane %v57_v46, %v789_v10  ;;  %635 = vst [vmem:[#allocation7 + $0x38] sm:$0xff] %v619_v15  ;;  %v495_v25 = vcombine.low %v239_v4, %v243_v18  ;;  %v255_v26 = vrot.slane %v57_v46, %v791_v11  ;;  %v259_v27 = vrot.slane %v57_v46, %v793_v12  ;;  %v49_v4 = vld [vmem:[#allocation2 + $0x68] sm:$0xff] }
  0x46   :  { %v263_v28 = vrot.slane %v58_v13, %v779_v5  ;;  %v620_v29 = vadd.f32 %v476_v20, %v44_v16  ;;  %v493_v30 = vcombine.low %v485_v17, %v492_v21  ;;  %v502_v31 = vrot.slane %v494_v22, %v795_v14  ;;  %v50_v20 = vld [vmem:[#allocation2 + $0x70] sm:$0xff] }
  0x47   :  { %v511_v32 = vcombine.low %v247_v19, %v251_v23  ;;  %v509_v33 = vrot.slane %v495_v25, %v795_v14  ;;  %v512_v34 = vcombine.low %v255_v26, %v259_v27  ;;  %v267_v35 = vrot.slane %v58_v13, %v781_v6 }
  0x48   :  { %v271_v36 = vrot.slane %v58_v13, %v783_v7  ;;  %636 = vst [vmem:[#allocation7 + $0x40] sm:$0xff] %v620_v29  ;;  %v621_v38 = vadd.f32 %v493_v30, %v45_v24  ;;  %v275_v41 = vrot.slane %v58_v13, %v785_v8  ;;  %v279_v42 = vrot.slane %v58_v13, %v787_v9 }
  0x49   :  { %v519_v40 = vrot.slane %v511_v32, %v795_v14  ;;  %v510_v43 = vcombine.low %v502_v31, %v509_v33  ;;  %v526_v44 = vrot.slane %v512_v34, %v795_v14  ;;  %v528_v45 = vcombine.low %v263_v28, %v267_v35 }
  0x4a   :  { %v283_v46 = vrot.slane %v58_v13, %v789_v10  ;;  %637 = vst [vmem:[#allocation7 + $0x48] sm:$0xff] %v621_v38  ;;  %v529_v48 = vcombine.low %v271_v36, %v275_v41  ;;  %v287_v49 = vrot.slane %v58_v13, %v791_v11  ;;  %v291_v50 = vrot.slane %v58_v13, %v793_v12 }
  0x4b   :  { %v295_v51 = vrot.slane %v59_v37, %v779_v5  ;;  %v622_v52 = vadd.f32 %v510_v43, %v46_v39  ;;  %v527_v53 = vcombine.low %v519_v40, %v526_v44  ;;  %v536_v54 = vrot.slane %v528_v45, %v795_v14 }
  0x4c   :  { %v545_v55 = vcombine.low %v279_v42, %v283_v46  ;;  %v543_v56 = vrot.slane %v529_v48, %v795_v14  ;;  %v546_v57 = vcombine.low %v287_v49, %v291_v50  ;;  %v299_v58 = vrot.slane %v59_v37, %v781_v6 }
  0x4d   :  { %v303_v59 = vrot.slane %v59_v37, %v783_v7  ;;  %638 = vst [vmem:[#allocation7 + $0x50] sm:$0xff] %v622_v52  ;;  %v623_v60 = vadd.f32 %v527_v53, %v47_v47  ;;  %v307_v63 = vrot.slane %v59_v37, %v785_v8  ;;  %v311_v5 = vrot.slane %v59_v37, %v787_v9 }
  0x4e   :  { %v553_v62 = vrot.slane %v545_v55, %v795_v14  ;;  %v544_v0 = vcombine.low %v536_v54, %v543_v56  ;;  %v560_v1 = vrot.slane %v546_v57, %v795_v14  ;;  %v562_v2 = vcombine.low %v295_v51, %v299_v58 }
  0x4f   :  { %v315_v3 = vrot.slane %v59_v37, %v789_v10  ;;  %639 = vst [vmem:[#allocation7 + $0x58] sm:$0xff] %v623_v60  ;;  %v563_v6 = vcombine.low %v303_v59, %v307_v63  ;;  %v319_v7 = vrot.slane %v59_v37, %v791_v11  ;;  %v323_v13 = vrot.slane %v59_v37, %v793_v12  ;;  %v51_v11 = vld [vmem:[#allocation2 + $0x78] sm:$0xff] }
  0x50   :  { %v624_v15 = vadd.f32 %v544_v0, %v48_v61  ;;  %v561_v16 = vcombine.low %v553_v62, %v560_v1  ;;  %v570_v17 = vrot.slane %v562_v2, %v795_v14 }
  0x51   :  { %v579_v8 = vcombine.low %v311_v5, %v315_v3  ;;  %v577_v9 = vrot.slane %v563_v6, %v795_v14  ;;  %v580_v18 = vcombine.low %v319_v7, %v323_v13 }
  0x52   :  { %640 = vst [vmem:[#allocation7 + $0x60] sm:$0xff] %v624_v15  ;;  %v625_v19 = vadd.f32 %v561_v16, %v49_v4 }
  0x53   :  { %v587_v10 = vrot.slane %v579_v8, %v795_v14  ;;  %v578_v21 = vcombine.low %v570_v17, %v577_v9  ;;  %v594_v22 = vrot.slane %v580_v18, %v795_v14 }
  0x54   :  { %641 = vst [vmem:[#allocation7 + $0x68] sm:$0xff] %v625_v19 }
  0x55   :  { %v626_v12 = vadd.f32 %v578_v21, %v50_v20  ;;  %v595_v23 = vcombine.low %v587_v10, %v594_v22 }
  0x57   :  { %642 = vst [vmem:[#allocation7 + $0x70] sm:$0xff] %v626_v12  ;;  %v627_v24 = vadd.f32 %v595_v23, %v51_v11 }
  0x59   :  { %643 = vst [vmem:[#allocation7 + $0x78] sm:$0xff] %v627_v24 }
  0x5a   :  { %719 = shalt.err (!%p716_p6)
}
  0x5b   :  { %s720_s8 = scalar_lea.hbm %s907_s2, 2048 }
  0x5c   :  { %p721_p7 = scmp.ne.s32.totalorder %s907_s2, %s720_s8  ;;  %p724_p8 = scmp.lt.u32.totalorder %s720_s8, %s907_s2 }
  0x5e   :  { %p726_p9 = pnand %p724_p8, %p721_p7 }
  0x60   :  { %729 = shalt.err (!%p726_p9)
}
  0x61   :  { %653 = dma.vmem_to_hbm [thread:$0]  %s651_s4, 2048, %s907_s2, [#allocation4]  }
  0x62   :  { %734 = dma.done.wait [#allocation4], 2048  }
  0x63   :  { %735 = vsyncadd [#allocation4], 4294965248 }
  0x64   :  { %657 = vsyncpa [#allocation3], 1 }
  0x65   :  { %658 = vsyncpa [#allocation6], 1 }
  0x66   :  { %659 = vsyncpa [#allocation4], 1 }

</bundles_post_ra>
